<compile_context>
chip_gen: v6e
topology: v6e:2x2x1
jax: 0.10.0
libtpu: 0.0.40
codegen_flags: <defaults>
</compile_context>

<pallas_src>
import jax
import jax.numpy as jnp
from jax.experimental import pallas as pl
from jax.experimental.pallas import tpu as pltpu

# Small, self-consistent sizes (stand-ins for config.SUBSTRATE_NODES etc.)
N_NODES = 16                    # config.SUBSTRATE_NODES
FEAT    = 4                     # chev_conv_state_dim
ACTION  = 16                    # action_dim
K_CHEB  = 3
EMB_ROWS = N_NODES + 3          # 19 rows of the flattened embedding
PAD_F   = 8                     # FEAT padded to a sublane multiple
CTR     = N_NODES + PAD_F       # 24: padded contraction dim of the head matmul
LANES   = 128

# Static-slab row offsets (all 8-aligned, everything starts at lane 0).
_R_LCAT = 0     # rows  0:16  lanes 0:32  -> [L_hat^T | (2 L_hat^2 - I)^T]
_R_WCH  = 16    # rows 16:22  lanes 0:24  -> fused Cheb weight^T  [6,24]
_R_BCH  = 24    # rows 24:30  lane  0     -> fused Cheb bias      [6,1]
_R_VW   = 32    # rows 32:38  lanes 0:8   -> 6x Linear(1,3) weight^T [6,8]
_R_VB   = 40    # rows 40:46  lanes 0:8   -> 6x Linear(1,3) bias^T   [6,8] (lane 7 == 1.0)
_R_WW   = 48    # rows 48:72  lanes 0:96  -> block-packed actor|critic fc [24,96] (+ folded biases)
P_ROWS  = _R_WW + CTR           # 72
D_ROWS  = 8                     # per-env data tile rows (one vreg: 8 x 128 f32)


def a3c_kernel(d_ref, p_ref, o_ref):
    # ---- per-env runtime data: exactly one (8,128) vreg --------------------
    d   = d_ref[0]                                     # [8,128]
    xT  = d[:, 0:N_NODES]                              # [8,16]  x^T (rows FEAT..7 zero)
    vnr = d[0:1, N_NODES:N_NODES + PAD_F]              # [1,8]   vnr (lanes 3..7 zero)

    # ---- static parameters (fetched once, resident across the grid) --------
    lcat = p_ref[_R_LCAT:_R_LCAT + N_NODES, 0:2 * N_NODES]   # [16,32] [L^T | (2L^2-I)^T]
    wch  = p_ref[_R_WCH:_R_WCH + 6, 0:K_CHEB * PAD_F]        # [6,24]  fused Cheb weight^T
    bch  = p_ref[_R_BCH:_R_BCH + 6, 0:1]                     # [6,1]   fused Cheb bias
    vw   = p_ref[_R_VW:_R_VW + 6, 0:PAD_F]                   # [6,8]   vnr weights^T
    vb   = p_ref[_R_VB:_R_VB + 6, 0:PAD_F]                   # [6,8]   vnr biases^T (lane 7 == 1.0)
    ww   = p_ref[_R_WW:_R_WW + CTR, 0:6 * ACTION]            # [24,96] head weights (+ folded fc biases)

    # ---- Chebyshev T1,T2 in ONE matmul (2L^2-I precomputed host-side) ------
    tx12 = jnp.dot(xT, lcat, preferred_element_type=jnp.float32)           # [8,32]
    txT = jnp.concatenate([xT, tx12[:, 0:N_NODES],
                           tx12[:, N_NODES:2 * N_NODES]], axis=0)          # [24,16]

    # ---- fused actor+critic ChebConv: one MXU matmul + tanh ----------------
    # rows 0:3 actor channels, rows 3:6 critic channels
    gT = jnp.tanh(jnp.dot(wch, txT, preferred_element_type=jnp.float32) + bch)  # [6,16]

    # ---- six Linear(1,3) vnr heads in one vector op (lane 7 becomes 1.0) ---
    vT = vw * vnr + vb                                                      # [6,8]

    # ---- combined embedding and BOTH final FCs as one matmul ---------------
    eT = jnp.concatenate([gT, vT], axis=1)                                  # [6,24], col 23 == 1.0
    q  = jnp.dot(eT, ww, preferred_element_type=jnp.float32)                # [6,96]

    # emb @ W (+bias, folded via the constant-1 column) = sum of matching blocks
    logits = (q[0:1, 0 * ACTION:1 * ACTION]
              + q[1:2, 1 * ACTION:2 * ACTION]
              + q[2:3, 2 * ACTION:3 * ACTION])                              # [1,16]
    value = (q[3:4, 3 * ACTION:4 * ACTION]
             + q[4:5, 4 * ACTION:5 * ACTION]
             + q[5:6, 5 * ACTION:6 * ACTION])                               # [1,16], lane 0 real

    # ---- write the (1,8,128) output tile directly ---------------------------
    o_ref[...] = jnp.zeros((1, 8, LANES), jnp.float32)
    o_ref[0, 0:1, 0:ACTION] = logits
    o_ref[0, 1:2, 0:ACTION] = value


def scaled_laplacian(edge_index, num_nodes):
    """ChebConv 'sym' normalization with default lambda_max=2.0: L_hat = L_sym - I."""
    row, col = edge_index[0], edge_index[1]
    w = jnp.ones(row.shape[0], jnp.float32)
    adj = jnp.zeros((num_nodes, num_nodes), jnp.float32).at[row, col].add(w)
    deg = adj.sum(axis=1)
    dinv = jnp.where(deg > 0, 1.0 / jnp.sqrt(deg), 0.0)
    norm_adj = dinv[:, None] * adj * dinv[None, :]
    L_sym = jnp.eye(num_nodes, dtype=jnp.float32) - norm_adj
    return L_sym - jnp.eye(num_nodes, dtype=jnp.float32)


def init_params(key):
    ks = jax.random.split(key, 12)
    u = lambda k, s: (jax.random.normal(k, s, jnp.float32) * 0.1)
    return dict(
        wa=u(ks[0], (K_CHEB * FEAT, 3)), ba=u(ks[1], (1, 3)),       # actor ChebConv
        wc=u(ks[2], (K_CHEB * FEAT, 3)), bc=u(ks[3], (1, 3)),       # critic ChebConv
        vwa=u(ks[4], (3, 3)), vba=u(ks[5], (3, 3)),                 # actor vnr fcs (3x Linear(1,3))
        vwc=u(ks[6], (3, 3)), vbc=u(ks[7], (3, 3)),                 # critic vnr fcs
        wfa=u(ks[8], (EMB_ROWS * 3, ACTION)), bfa=u(ks[9], (1, ACTION)),   # actor_fc  (in,out)
        wfc=u(ks[10], (EMB_ROWS * 3, 1)),     bfc=u(ks[11], (1, 1)),       # critic_fc (in,out)
    )


def pack_static(params, edge_index):
    """One-time setup: graph operators + ALL weights into one [72,128] f32 slab."""
    f32 = jnp.float32
    L = scaled_laplacian(edge_index, N_NODES)
    L2 = 2.0 * (L @ L) - jnp.eye(N_NODES, dtype=f32)                 # tx2 = (2L^2 - I) x
    lcat = jnp.concatenate([L.T, L2.T], axis=1)                      # [16,32]

    # Fused ChebConv weights (cols 0:3 actor, 3:6 critic), transposed; each
    # Chebyshev order occupies an 8-column slot so the in-kernel concat stays aligned.
    w_fused = jnp.concatenate([params["wa"], params["wc"]], axis=1)  # [3F,6]
    w_k = w_fused.reshape(K_CHEB, FEAT, 6)
    w_k = jnp.concatenate([w_k, jnp.zeros((K_CHEB, PAD_F - FEAT, 6), f32)], axis=1)  # [3,8,6]
    wch = jnp.transpose(w_k, (2, 0, 1)).reshape(6, K_CHEB * PAD_F)   # [6,24]
    bch = jnp.concatenate([params["ba"], params["bc"]], axis=1).reshape(6, 1)

    # vnr Linear(1,3) weights/biases, transposed (rows 0:3 actor, 3:6 critic).
    # vb lane 7 == 1.0 -> constant-1 embedding column used for fc-bias folding.
    vw = jnp.concatenate([params["vwa"].T, params["vwc"].T], axis=0)         # [6,3]
    vb = jnp.concatenate([params["vba"].T, params["vbc"].T], axis=0)
    vw = jnp.concatenate([vw, jnp.zeros((6, PAD_F - 3), f32)], axis=1)       # [6,8]
    vb = jnp.concatenate([vb, jnp.zeros((6, PAD_F - 4), f32),
                          jnp.ones((6, 1), f32)], axis=1)                    # [6,8]

    # Final FCs as one block-structured [24,96] matrix: lane block c (c=0..2)
    # holds actor_fc rows for embedding channel c; blocks 3..5 hold critic_fc.
    # Row 23 (the constant-1 embedding column) carries the folded fc biases.
    wfa3 = params["wfa"].reshape(EMB_ROWS, 3, ACTION)
    wfc3 = params["wfc"].reshape(EMB_ROWS, 3, 1)
    actor_wide = jnp.concatenate([wfa3[:, c, :] for c in range(3)], axis=1)  # [19,48]
    critic_wide = jnp.concatenate(
        [jnp.concatenate([wfc3[:, c, :], jnp.zeros((EMB_ROWS, ACTION - 1), f32)], axis=1)
         for c in range(3)], axis=1)                                         # [19,48]
    ww = jnp.concatenate([actor_wide, critic_wide], axis=1)                  # [19,96]
    bias_row = jnp.concatenate(
        [params["bfa"], jnp.zeros((1, 2 * ACTION), f32),
         params["bfc"], jnp.zeros((1, ACTION - 1), f32),
         jnp.zeros((1, 2 * ACTION), f32)], axis=1)                           # [1,96]
    ww = jnp.concatenate(
        [ww, jnp.zeros((CTR - EMB_ROWS - 1, 6 * ACTION), f32), bias_row], axis=0)  # [24,96]

    p = jnp.zeros((P_ROWS, LANES), f32)
    p = p.at[_R_LCAT:_R_LCAT + N_NODES, 0:2 * N_NODES].set(lcat)
    p = p.at[_R_WCH:_R_WCH + 6, 0:K_CHEB * PAD_F].set(wch)
    p = p.at[_R_BCH:_R_BCH + 6, 0:1].set(bch)
    p = p.at[_R_VW:_R_VW + 6, 0:PAD_F].set(vw)
    p = p.at[_R_VB:_R_VB + 6, 0:PAD_F].set(vb)
    p = p.at[_R_WW:_R_WW + CTR, 0:6 * ACTION].set(ww)
    return p


@jax.jit
def a3c_forward_batch(packed_params, substrate_features, vnr_features):
    """Per-step path: substrate_features (B,N,F), vnr_features (B,3) -> logits (B,A), values (B,1)."""
    f32 = jnp.float32
    B = substrate_features.shape[0]

    # Minimal per-step packing: one (8,128) tile per env (x^T + vnr row).
    xT = jnp.swapaxes(substrate_features.astype(f32), 1, 2)          # (B,F,N)
    d = jnp.zeros((B, D_ROWS, LANES), f32)
    d = d.at[:, 0:FEAT, 0:N_NODES].set(xT)
    d = d.at[:, 0, N_NODES:N_NODES + 3].set(vnr_features.astype(f32))

    out = pl.pallas_call(
        a3c_kernel,
        out_shape=jax.ShapeDtypeStruct((B, 8, LANES), jnp.float32),
        grid_spec=pltpu.PrefetchScalarGridSpec(
            num_scalar_prefetch=0,
            grid=(B,),
            in_specs=[
                pl.BlockSpec((1, D_ROWS, LANES), lambda b: (b, 0, 0)),   # per-env data
                pl.BlockSpec((P_ROWS, LANES), lambda b: (0, 0)),         # resident param slab
            ],
            out_specs=pl.BlockSpec((1, 8, LANES), lambda b: (b, 0, 0)),
        ),
        compiler_params=pltpu.CompilerParams(
            dimension_semantics=("parallel",),        # v7x: shard envs across both TCs
            vmem_limit_bytes=4 * 1024 * 1024),
    )(d, packed_params)

    # TODO(synk): for very large B on v5e/v6e, stack ~8-16 envs per grid step along
    # the matmul lane dimension (>=128/256 lanes) to fill one full MXU pass per block.
    return out[:, 0, :ACTION], out[:, 1, 0:1]


def a3c_forward_single(packed_params, substrate_features, vnr_features):
    """Convenience wrapper matching the module's single-step forward (graph baked into the slab)."""
    vnr = jnp.asarray(vnr_features, jnp.float32).reshape(-1, 3)
    assert vnr.shape[0] == 1, "A3C_Model forward is only defined for a single VNR row"
    logits, values = a3c_forward_batch(packed_params, substrate_features[None], vnr[0:1])
    return logits, values


def a3c_forward_ref(substrate_features, substrate_edge_index, vnr_features, params):
    """Pure-JAX reference for correctness check (single env)."""
    L = scaled_laplacian(substrate_edge_index, N_NODES)
    x = substrate_features.astype(jnp.float32)
    vnr_row = jnp.asarray(vnr_features, jnp.float32).reshape(-1, 3)[0]

    def cheb(w, b):
        w0, w1, w2 = w[:FEAT], w[FEAT:2 * FEAT], w[2 * FEAT:]
        tx0 = x
        tx1 = L @ x
        tx2 = 2.0 * (L @ tx1) - tx0
        return jnp.tanh(tx0 @ w0 + tx1 @ w1 + tx2 @ w2 + b)

    gcn_a = cheb(params["wa"], params["ba"])
    gcn_c = cheb(params["wc"], params["bc"])
    v_a = vnr_row[:, None] * params["vwa"] + params["vba"]
    v_c = vnr_row[:, None] * params["vwc"] + params["vbc"]
    emb_a = jnp.concatenate([gcn_a, v_a], axis=0).reshape(1, -1)
    emb_c = jnp.concatenate([gcn_c, v_c], axis=0).reshape(1, -1)
    return emb_a @ params["wfa"] + params["bfa"], emb_c @ params["wfc"] + params["bfc"]


if __name__ == "__main__":
    key = jax.random.PRNGKey(0)
    k_x, k_v, k_p = jax.random.split(key, 3)
    B = 8                                            # batch of environment steps

    # Ring graph over the substrate nodes (both directions) - static topology.
    src = jnp.arange(N_NODES, dtype=jnp.int32)
    dst = (src + 1) % N_NODES
    edge_index = jnp.stack([jnp.concatenate([src, dst]),
                            jnp.concatenate([dst, src])], axis=0)     # [2, 2N]

    substrate_features = jax.random.normal(k_x, (B, N_NODES, FEAT), jnp.float32)
    vnr_features = jax.random.uniform(k_v, (B, 3), jnp.float32)
    params = init_params(k_p)

    packed = pack_static(params, edge_index)   # one-time setup (hoisted out of the step path)

    logits, values = a3c_forward_batch(packed, substrate_features, vnr_features)
    jax.block_until_ready((logits, values))
    assert logits.shape == (B, ACTION) and values.shape == (B, 1)

    # Correctness vs. the pure-JAX reference, per environment.
    for b in range(B):
        logits_ref, values_ref = a3c_forward_ref(substrate_features[b], edge_index,
                                                 vnr_features[b], params)
        assert jnp.allclose(logits[b:b + 1], logits_ref, atol=1e-4, rtol=1e-4), \
            (b, float(jnp.max(jnp.abs(logits[b:b + 1] - logits_ref))))
        assert jnp.allclose(values[b:b + 1], values_ref, atol=1e-4, rtol=1e-4), \
            (b, float(jnp.max(jnp.abs(values[b:b + 1] - values_ref))))

    # Single-step convenience path (matches the module's forward signature semantics).
    l1, v1 = a3c_forward_single(packed, substrate_features[0], vnr_features[0])
    jax.block_until_ready((l1, v1))
    assert jnp.allclose(l1, logits[0:1], atol=1e-5) and jnp.allclose(v1, values[0:1], atol=1e-5)

    # TODO(synk): select_node / loss_func (Categorical sampling, log_prob, loss
    # reductions) are host-side training utilities, not part of the forward hot
    # path, so they are not implemented as Pallas kernels.
    print("KERNEL_OK")
</pallas_src>

<mosaic_0001>
module attributes {stable_mosaic.version = 11 : i64} {
  func.func @a3c_kernel(%arg0: i32, %arg1: memref<1x8x128xf32, #tpu.memory_space<vmem>>, %arg2: memref<72x128xf32, #tpu.memory_space<vmem>>, %arg3: memref<1x8x128xf32, #tpu.memory_space<vmem>>) attributes {dimension_semantics = [#tpu.dimension_semantics<parallel>], iteration_bounds = array<i64: 8>, scalar_prefetch = 0 : i64, scratch_operands = 0 : i64, tpu.core_type = #tpu.core_type<tc>, window_params = [{transform_indices = @transform_0, window_bounds = array<i64: 1, 8, 128>}, {pipeline_mode = #tpu.pipeline_mode<synchronous>, transform_indices = @transform_1, window_bounds = array<i64: 72, 128>}, {transform_indices = @transform_2, window_bounds = array<i64: 1, 8, 128>}]} {
    %c0 = arith.constant 0 : index
    %c0_0 = arith.constant 0 : index
    %c0_1 = arith.constant 0 : index
    %0 = vector.load %arg1[%c0, %c0_0, %c0_1] : memref<1x8x128xf32, #tpu.memory_space<vmem>>, vector<1x8x128xf32>
    %1 = vector.shape_cast %0 : vector<1x8x128xf32> to vector<8x128xf32>
    %2 = vector.extract_strided_slice %1 {offsets = [0, 0], sizes = [8, 16], strides = [1, 1]} : vector<8x128xf32> to vector<8x16xf32>
    %3 = vector.extract_strided_slice %1 {offsets = [0, 16], sizes = [1, 8], strides = [1, 1]} : vector<8x128xf32> to vector<1x8xf32>
    %c0_2 = arith.constant 0 : index
    %c0_3 = arith.constant 0 : index
    %4 = vector.load %arg2[%c0_2, %c0_3] : memref<72x128xf32, #tpu.memory_space<vmem>>, vector<16x32xf32>
    %c16 = arith.constant 16 : index
    %c0_4 = arith.constant 0 : index
    %5 = vector.load %arg2[%c16, %c0_4] : memref<72x128xf32, #tpu.memory_space<vmem>>, vector<6x24xf32>
    %c24 = arith.constant 24 : index
    %c0_5 = arith.constant 0 : index
    %6 = vector.load %arg2[%c24, %c0_5] : memref<72x128xf32, #tpu.memory_space<vmem>>, vector<6x1xf32>
    %c32 = arith.constant 32 : index
    %c0_6 = arith.constant 0 : index
    %7 = vector.load %arg2[%c32, %c0_6] : memref<72x128xf32, #tpu.memory_space<vmem>>, vector<6x8xf32>
    %c40 = arith.constant 40 : index
    %c0_7 = arith.constant 0 : index
    %8 = vector.load %arg2[%c40, %c0_7] : memref<72x128xf32, #tpu.memory_space<vmem>>, vector<6x8xf32>
    %c48 = arith.constant 48 : index
    %c0_8 = arith.constant 0 : index
    %9 = vector.load %arg2[%c48, %c0_8] : memref<72x128xf32, #tpu.memory_space<vmem>>, vector<24x96xf32>
    %cst = arith.constant dense<0.000000e+00> : vector<8x32xf32>
    %10 = tpu.matmul %2, %4, %cst {dimension_numbers = #tpu.dot_dimension_numbers<[1], [0], [0], [1], [0, 0, 1, 1], [], []>} : vector<8x16xf32>, vector<16x32xf32>, vector<8x32xf32> -> vector<8x32xf32>
    %11 = vector.extract_strided_slice %10 {offsets = [0, 0], sizes = [8, 16], strides = [1, 1]} : vector<8x32xf32> to vector<8x16xf32>
    %12 = vector.extract_strided_slice %10 {offsets = [0, 16], sizes = [8, 16], strides = [1, 1]} : vector<8x32xf32> to vector<8x16xf32>
    %13 = tpu.concatenate %2, %11, %12 in 0 : vector<8x16xf32>, vector<8x16xf32>, vector<8x16xf32> -> vector<24x16xf32>
    %cst_9 = arith.constant dense<0.000000e+00> : vector<6x16xf32>
    %14 = tpu.matmul %5, %13, %cst_9 {dimension_numbers = #tpu.dot_dimension_numbers<[1], [0], [0], [1], [0, 0, 1, 1], [], []>} : vector<6x24xf32>, vector<24x16xf32>, vector<6x16xf32> -> vector<6x16xf32>
    %15 = vector.broadcast %6 : vector<6x1xf32> to vector<6x16xf32>
    %16 = arith.addf %14, %15 : vector<6x16xf32>
    %17 = math.tanh %16 : vector<6x16xf32>
    %18 = vector.broadcast %3 : vector<1x8xf32> to vector<6x8xf32>
    %19 = arith.mulf %7, %18 : vector<6x8xf32>
    %20 = arith.addf %19, %8 : vector<6x8xf32>
    %21 = tpu.concatenate %17, %20 in 1 : vector<6x16xf32>, vector<6x8xf32> -> vector<6x24xf32>
    %cst_10 = arith.constant dense<0.000000e+00> : vector<6x96xf32>
    %22 = tpu.matmul %21, %9, %cst_10 {dimension_numbers = #tpu.dot_dimension_numbers<[1], [0], [0], [1], [0, 0, 1, 1], [], []>} : vector<6x24xf32>, vector<24x96xf32>, vector<6x96xf32> -> vector<6x96xf32>
    %23 = vector.extract_strided_slice %22 {offsets = [0, 0], sizes = [1, 16], strides = [1, 1]} : vector<6x96xf32> to vector<1x16xf32>
    %24 = vector.extract_strided_slice %22 {offsets = [1, 16], sizes = [1, 16], strides = [1, 1]} : vector<6x96xf32> to vector<1x16xf32>
    %25 = arith.addf %23, %24 : vector<1x16xf32>
    %26 = vector.extract_strided_slice %22 {offsets = [2, 32], sizes = [1, 16], strides = [1, 1]} : vector<6x96xf32> to vector<1x16xf32>
    %27 = arith.addf %25, %26 : vector<1x16xf32>
    %28 = vector.extract_strided_slice %22 {offsets = [3, 48], sizes = [1, 16], strides = [1, 1]} : vector<6x96xf32> to vector<1x16xf32>
    %29 = vector.extract_strided_slice %22 {offsets = [4, 64], sizes = [1, 16], strides = [1, 1]} : vector<6x96xf32> to vector<1x16xf32>
    %30 = arith.addf %28, %29 : vector<1x16xf32>
    %31 = vector.extract_strided_slice %22 {offsets = [5, 80], sizes = [1, 16], strides = [1, 1]} : vector<6x96xf32> to vector<1x16xf32>
    %32 = arith.addf %30, %31 : vector<1x16xf32>
    %cst_11 = arith.constant 0.000000e+00 : f32
    %33 = vector.broadcast %cst_11 : f32 to vector<1x8x128xf32>
    %c0_12 = arith.constant 0 : index
    %c0_13 = arith.constant 0 : index
    %c0_14 = arith.constant 0 : index
    %34 = vector.load %arg3[%c0_12, %c0_13, %c0_14] : memref<1x8x128xf32, #tpu.memory_space<vmem>>, vector<1x8x128xf32>
    tpu.vector_store %arg3[%c0_12, %c0_13, %c0_14], %33 {strides = array<i32>} : memref<1x8x128xf32, #tpu.memory_space<vmem>>, vector<1x8x128xf32>,
    %c0_15 = arith.constant 0 : index
    %c0_16 = arith.constant 0 : index
    %c0_17 = arith.constant 0 : index
    %35 = vector.load %arg3[%c0_15, %c0_16, %c0_17] : memref<1x8x128xf32, #tpu.memory_space<vmem>>, vector<1x1x16xf32>
    %36 = vector.shape_cast %35 : vector<1x1x16xf32> to vector<1x16xf32>
    %37 = vector.shape_cast %27 : vector<1x16xf32> to vector<1x1x16xf32>
    tpu.vector_store %arg3[%c0_15, %c0_16, %c0_17], %37 {strides = array<i32>} : memref<1x8x128xf32, #tpu.memory_space<vmem>>, vector<1x1x16xf32>,
    %c0_18 = arith.constant 0 : index
    %c1 = arith.constant 1 : index
    %c0_19 = arith.constant 0 : index
    %38 = vector.load %arg3[%c0_18, %c1, %c0_19] : memref<1x8x128xf32, #tpu.memory_space<vmem>>, vector<1x1x16xf32>
    %39 = vector.shape_cast %38 : vector<1x1x16xf32> to vector<1x16xf32>
    %40 = vector.shape_cast %32 : vector<1x16xf32> to vector<1x1x16xf32>
    tpu.vector_store %arg3[%c0_18, %c1, %c0_19], %40 {strides = array<i32>} : memref<1x8x128xf32, #tpu.memory_space<vmem>>, vector<1x1x16xf32>,
    return
  }
  func.func @transform_0(%arg0: i32) -> (i32, i32, i32) {
    %c0_i32 = arith.constant 0 : i32
    %c0_i32_0 = arith.constant 0 : i32
    %c0_i32_1 = arith.constant 0 : i32
    return %arg0, %c0_i32, %c0_i32_0 : i32, i32, i32
  }
  func.func @transform_1(%arg0: i32) -> (i32, i32) {
    %c0_i32 = arith.constant 0 : i32
    %c0_i32_0 = arith.constant 0 : i32
    %c0_i32_1 = arith.constant 0 : i32
    return %c0_i32, %c0_i32_0 : i32, i32
  }
  func.func @transform_2(%arg0: i32) -> (i32, i32, i32) {
    %c0_i32 = arith.constant 0 : i32
    %c0_i32_0 = arith.constant 0 : i32
    %c0_i32_1 = arith.constant 0 : i32
    return %arg0, %c0_i32, %c0_i32_0 : i32, i32, i32
  }
}

</mosaic_0001>

<bundles_post_ra>
// kernel: a3c_forward_batch.1
= control target key start
LH: loop header
LB: loop body
LE: loop exit
PB: predicated region body
PF: predicated region fallthrough
CT: control target
= control target key end

     0   :  { %s565_s9 = smov 0   ;;  %s624_s0 = inlined_call_operand.vmem [shape: f32[8,8,128], index: 0, kind: input, shape index: {}]   ;;  %s625_s1 = inlined_call_operand.vmem [shape: f32[72,128], index: 1, kind: input, shape index: {}]   ;;  %s626_s2 = inlined_call_operand.vmem [shape: f32[8,8,128], index: 2, kind: output, shape index: {}]  }
   0x1 LB: > { %s468_s10 = sadd.s32 4294967295, %s541_s9   ;;  %p472_p0 = scmp.ge.s32.totalorder %s541_s9, 1  ;;  %s541_s9 = sphi %s565_s9, %s12_s9  }
   0x2   : > { %p111_p1 = scmp.lt.s32.totalorder %s541_s9, 9 }
   0x4   : > { %p112_p2 = pnand %p472_p0, %p111_p1 }
   0x5   : > { %p131_p3 = scmp.lt.s32.totalorder (!%p112_p2), %s468_s10, 7  ;;  %s546_s24 = smov (!%p112_p2), 112  }
   0x6   : > { %115 = sbr.rel (%p112_p2) target bundleno = 969 (0x3c9), region = 28  ;;  %s547_s3 = smov (!%p112_p2), 16  }
   0x7   : > { %s548_s11 = smov (!%p112_p2), 96   ;;  %s549_s12 = smov (!%p112_p2), 80  }
   0xb   : > { %v141_v0 = vld [vmem:[%s625_s1 + $0x8] sm:$0xff]  ;;  %v543_v1 = vmov 0.0   ;;  %v140_v2 = vld [vmem:[%s625_s1] sm:$0xff]  ;;  %vm544_vm0 = vmmov 0   ;;  %s628_s10 = smov (!%p131_p3, %s468_s10), 7  ;;  %vm149_vm1 = vcmask 130048   ;;  %v307_v4 = vlaneseq }
   0xc   : > { %491 = vmatprep.subr.mxu0 %v543_v1  ;;  %495 = vmatprep.mubr.msk.f32.mxu0 %vm544_vm0, %v543_v1  ;;  %s473_s15 = sshll.u32 %s628_s10, 3  ;;  %v143_v6 = vld [vmem:[%s625_s1 + $0x18] sm:$0x3f]  ;;  %v545_v7 = vmov 0   ;;  %v144_v13 = vld [vmem:[%s625_s1 + $0x20] sm:$0x3f] }
   0xd   : > { %492 = vmatpush3.msra.mxu0 %v141_v0  ;;  %498 = vmatprep.subr.mxu1 %v543_v1  ;;  %s134_s18 = scalar_lea.vmem %s624_s0, %s473_s15  ;;  %s587_s21 = scalar_lea.vmem %s626_s2, %s473_s15  ;;  %v308_v5 = vshrl.u32 %v307_v4, 7  ;;  %v142_v14 = vld [vmem:[%s625_s1 + $0x10] sm:$0x3f]  ;;  %vm232_vm2 = vcmask 195584   ;;  %v145_v15 = vld [vmem:[%s625_s1 + $0x28] sm:$0x3f] }
   0xe   : > { %493 = vmatprep.subr.mxu0 %v543_v1  ;;  %504 = vmatprep.mubr.msk.f32.mxu1 %vm544_vm0, %v543_v1  ;;  %v139_v3 = vld [vmem:[%s134_s18] sm:$0xff]  ;;  %406 = vst [vmem:[%s587_s21] sm:$0xff] %v543_v1  ;;  %v147_v20 = vld [vmem:[%s625_s1 + $0x38] sm:$0xff]  ;;  %v146_v21 = vld [vmem:[%s625_s1 + $0x30] sm:$0xff]  ;;  %vm407_vm3 = vcmask 122880   ;;  %vm413_vm4 = vcmask 125955  }
   0xf   : > { %494 = vmatpush3.msra.mxu0 %v140_v2  ;;  %531 = vset.pattern.permute.xlu1 %v545_v7  ;;  %v309_v8 = vsub.s32 0, %v308_v5  ;;  %v148_v19 = vld [vmem:[%s625_s1 + $0x40] sm:$0xff] }
  0x10   : > { %507 = vmatprep.subr.mxu0 %v543_v1  ;;  %496 = vmatmul.mubr.msk.f32.vlgmr.msra.gmra.mxu0 %vm149_vm1, %v139_v3 }
  0x11   : > { %513 = vmatprep.mubr.msk.f32.mxu0 %vm544_vm0, %v543_v1  ;;  %532 = vset.pattern.permute.xlu0 %v545_v7  ;;  %v310_v10 = vrot.slane %v139_v3, %v309_v8 }
  0x12   : > { %229 = vperm.xlu1 %531, %v143_v6   ;;  %508 = vmatpush3.msra.mxu0 %v148_v19 }
  0x13   : > { %509 = vmatprep.subr.mxu0 %v543_v1 }
  0x14   : > { %510 = vmatpush3.msra.mxu0 %v147_v20 }
  0x15   : > { %511 = vmatprep.subr.mxu0 %v543_v1 }
  0x16   : > { %512 = vmatpush3.msra.mxu0 %v146_v21 }
  0x8d   : > { %v230_v22 = vpop.permute.xlu1 %229 }
  0xd0   : > { %v219_v9 = vpop.f32.mrf.mxu0 }
  0xd1   : > { %224 = vrot.lane.b32.xlu0 %v219_v9, %s546_s24 }
  0xd2   : > { %v497_v11 = vpop.f32.mrf.mxu0 }
  0xd5   : > { %312 = vrot.lane.b32.xlu0 %v310_v10, %s546_s24 }
 0x143   : > { %v225_v12 = vpop.permute.xlu0 %224 }
 0x144   : > { %499 = vmatpush3.msra.mxu1 %v225_v12 }
 0x145   : > { %500 = vmatprep.subr.mxu1 %v543_v1 }
 0x146   : > { %501 = vmatpush3.msra.mxu1 %v219_v9 }
 0x147   : > { %502 = vmatprep.subr.mxu1 %v543_v1  ;;  %v313_v16 = vpop.permute.xlu0 %312 }
 0x148   : > { %503 = vmatpush3.msra.mxu1 %v139_v3  ;;  %v315_v17 = vmul.f32 %v313_v16, %v144_v13 }
 0x149   : > { %505 = vmatmul.mubr.msk.f32.vlgmr.msra.gmra.mxu1 %vm232_vm2, %v142_v14 }
 0x14a   : > { %v316_v18 = vadd.f32 %v315_v17, %v145_v15 }
 0x14c   : > { %318 = vrot.lane.b32.xlu1 %v316_v18, %s547_s3 }
 0x1be   : > { %v319_v26 = vpop.permute.xlu1 %318 }
 0x209   : > { %v302_v23 = vpop.f32.mrf.mxu1 }
 0x20a   : > { %v303_v24 = vadd.f32 %v302_v23, %v230_v22 }
 0x20b   : > { %v506_v25 = vpop.f32.mrf.mxu1 }
 0x20c   : > { %533 = vtanh.f32 %v303_v24 }
 0x219   : > { %v534_v27 = vpop.eup %533 }
 0x21a   : > { %v321_v28 = vsel %vm149_vm1, %v534_v27, %v319_v26 }
 0x21b   : > { %514 = vmatmul.mubr.msk.f32.vlgmr.msra.gmra.mxu0 %vm232_vm2, %v321_v28 }
 0x2db   : > { %v391_v29 = vpop.f32.mrf.mxu0 }
 0x2dc   : > { %v396_v30 = vrot.slane %v391_v29, 1  ;;  %v401_v31 = vrot.slane %v391_v29, 2 }
 0x2dd   : > { %v515_v32 = vpop.f32.mrf.mxu0 }
 0x2de   : > { %402 = vrot.lane.b32.xlu1 %v401_v31, %s548_s11  ;;  %397 = vrot.lane.b32.xlu0 %v396_v30, %s546_s24 }
 0x350   : > { %v398_v33 = vpop.permute.xlu0 %397  ;;  %v403_v35 = vpop.permute.xlu1 %402 }
 0x351   : > { %v400_v34 = vadd.f32 %v398_v33, %v391_v29 }
 0x353   : > { %v405_v36 = vadd.f32 %v403_v35, %v400_v34 }
 0x355   : > { %410 = vrot.lane.b32.xlu0 %v405_v36, %s549_s12  ;;  %408 = vst.msk [vmem:[%s587_s21] sm:$0x1] %vm407_vm3, %v405_v36 }
 0x3c7   : > { %v411_v37 = vpop.permute.xlu0 %410 }
 0x3c8   : > { %414 = vst.msk [vmem:[%s587_s21 - $0x2] sm:$0x8] %vm413_vm4, %v411_v37 }
 0x3c9 PF: > { %s12_s9 = sadd.s32 1, %s541_s9  }
 0x3ca   : > { %p9_p4 = scmp.ge.s32.totalorder %s12_s9, 10  }
 0x3cc   :  { %11 = sbr.rel (!%p9_p4) target bundleno = 1 (0x1), region = 58 }

</bundles_post_ra>
